<compile_context>
chip_gen: v5e
topology: v5e:2x2
jax: 0.10.0
libtpu: 0.0.40
codegen_flags: <defaults>
</compile_context>

<pallas_src>
import jax
import jax.numpy as jnp
from jax import lax
from jax.experimental import pallas as pl
from jax.experimental.pallas import tpu as pltpu


def _round_up(x, m):
    return ((x + m - 1) // m) * m


def _disc_kernel(x_ref, w1_ref, b1_ref, w2_ref, b2_ref, o_ref):
    """One batch tile of sigmoid(relu(x @ W1^T + b1) @ W2^T + b2).

    x_ref  : (tile_b, in_dim)   batch rows (bf16 or f32)
    w1_ref : (hidden, in_dim)   torch nn.Linear layout (out, in), resident
    b1_ref : (hidden, 1)  f32
    w2_ref : (hidden, 1)  f32   fc2 weight as a column
    b2_ref : (1, 1)       f32   SMEM scalar
    o_ref  : (1, tile_b)  f32   lane-dense output row
    """
    # fc1, computed transposed: h_T = W1 @ x^T -> (hidden, tile_b).
    # Both operands contract their last dim, so the MXU produces a lane-dense
    # result without transposing x in HBM.  Accumulation is f32.
    h_t = lax.dot_general(
        w1_ref[...], x_ref[...],
        dimension_numbers=(((1,), (1,)), ((), ())),
        preferred_element_type=jnp.float32,
    )
    h_t = jnp.maximum(h_t + b1_ref[...], 0.0)                  # bias + ReLU (VPU)

    # fc2 has a single output feature: an N=1 MXU matmul would waste the array,
    # so do it as a VPU multiply + cross-sublane reduce (XLU) -> (1, tile_b).
    z = jnp.sum(h_t * w2_ref[...], axis=0, keepdims=True)
    z = z + b2_ref[0, 0]                                       # scalar bias (SMEM)

    # Exact sigmoid: z is only one (1, tile_b) row, so the EUP cost is
    # negligible and the ~1e-3 error of the approximate reciprocal is avoided.
    o_ref[...] = jax.nn.sigmoid(z).astype(o_ref.dtype)


def _pick_tile_b(b_pad, max_tile_b, min_grid_steps=1):
    """Largest multiple-of-128 divisor of b_pad that respects max_tile_b and
    (optionally, for v7x megacore) a minimum number of grid steps."""
    m = b_pad // 128
    cap = max(1, min(max_tile_b // 128, m // max(1, min_grid_steps)))
    best = 1
    for d in range(1, m + 1):
        if m % d == 0 and d <= cap:
            best = d
    return best * 128


def _vmem_limit_bytes(tile_b, in_dim, hidden, mxu_itemsize):
    """Honest VMEM request derived from the actual tile footprint."""
    lane = 128
    in_pad = _round_up(in_dim, lane)
    tb_pad = _round_up(tile_b, lane)
    h_pad = _round_up(hidden, 8)
    x_buf = 2 * tile_b * in_pad * mxu_itemsize          # double-buffered x tile
    w1_buf = 2 * h_pad * in_pad * mxu_itemsize          # resident W1 (still 2 bufs)
    h_t = h_pad * tb_pad * 4                            # (hidden, tile_b) f32 interm.
    cols = 4 * h_pad * lane * 4                         # b1 + w2 columns, 2 bufs each
    out_buf = 2 * 8 * tb_pad * 4                        # (1, tile_b) output, sublane-padded
    total = x_buf + w1_buf + h_t + cols + out_buf
    total = int(total * 2) + (4 << 20)                  # headroom (spill, pipeline temps)
    return int(min(max(total, 8 << 20), 96 << 20))


def prepare_params(w1, b1, w2, b2, mxu_dtype=jnp.bfloat16):
    """One-time parameter prep (hoisted out of the per-call wrapper).

    w1: (hidden, input_size), b1: (hidden,)   -- nn.Linear(input_size, hidden)
    w2: (1, hidden),          b2: (1,)        -- nn.Linear(hidden, 1)
    mxu_dtype: dtype used for the fc1 MXU operands (bf16 default, f32 accum).
    """
    hidden = w1.shape[0]
    return {
        "w1": w1.astype(mxu_dtype),
        "b1": b1.reshape(hidden, 1).astype(jnp.float32),
        "w2": w2.reshape(hidden, 1).astype(jnp.float32),
        "b2": b2.reshape(1, 1).astype(jnp.float32),
        "mxu_dtype": mxu_dtype,
    }


def discriminator_forward(x, params, *, tile_b=None, max_tile_b=8192,
                          min_grid_steps=1):
    """sigmoid(relu(x @ W1^T + b1) @ W2^T + b2).  x: (B, input_size) f32.

    Returns (B, 1) f32.  Padded rows (batch padded to a multiple of 128) are
    computed but sliced off; the (1, b_pad) lane-dense kernel output maps to
    the (B, 1) column by a flat reshape (order preserved, no transpose).
    """
    B, in_dim = x.shape
    w1, b1, w2, b2 = params["w1"], params["b1"], params["w2"], params["b2"]
    mxu_dtype = params["mxu_dtype"]
    hidden, in_dim_w = w1.shape
    assert in_dim == in_dim_w, (in_dim, in_dim_w)

    # Pad the batch only to the next multiple of 128 (not to tile_b).
    # TODO(synk): for very large ragged batches, process the 128-aligned prefix
    # unpadded and pad only the tail tile to avoid the full-x pad copy.
    b_pad = _round_up(B, 128)
    if b_pad != B:
        x = jnp.pad(x, ((0, b_pad - B), (0, 0)))
    if x.dtype != mxu_dtype:
        x = x.astype(mxu_dtype)

    if tile_b is None:
        tile_b = _pick_tile_b(b_pad, max_tile_b, min_grid_steps)
    assert tile_b % 128 == 0 and b_pad % tile_b == 0, (tile_b, b_pad)

    mxu_itemsize = jnp.dtype(mxu_dtype).itemsize
    cost = pl.CostEstimate(
        flops=2 * b_pad * hidden * in_dim + 4 * b_pad * hidden,
        transcendentals=b_pad,
        bytes_accessed=(b_pad * in_dim * mxu_itemsize            # x
                        + hidden * in_dim * mxu_itemsize         # W1
                        + 2 * hidden * 4 + 4                     # b1, W2, b2
                        + b_pad * 4),                            # output
    )

    grid = (b_pad // tile_b,)
    out = pl.pallas_call(
        _disc_kernel,
        out_shape=jax.ShapeDtypeStruct((1, b_pad), jnp.float32),
        grid_spec=pltpu.PrefetchScalarGridSpec(
            num_scalar_prefetch=0,
            grid=grid,
            in_specs=[
                pl.BlockSpec((tile_b, in_dim), lambda i: (i, 0)),      # x tile
                pl.BlockSpec((hidden, in_dim), lambda i: (0, 0)),      # W1 (resident)
                pl.BlockSpec((hidden, 1), lambda i: (0, 0)),           # b1 column
                pl.BlockSpec((hidden, 1), lambda i: (0, 0)),           # W2 column
                pl.BlockSpec(memory_space=pltpu.MemorySpace.SMEM),     # b2 scalar
            ],
            out_specs=pl.BlockSpec((1, tile_b), lambda i: (0, i)),     # lane-dense row
        ),
        compiler_params=pltpu.CompilerParams(
            dimension_semantics=("parallel",),
            vmem_limit_bytes=_vmem_limit_bytes(tile_b, in_dim, hidden, mxu_itemsize),
        ),
        cost_estimate=cost,
    )(x, w1, b1, w2, b2)

    # (1, b_pad) row -> (B, 1) column; flat order is preserved, no transpose.
    return out.reshape(-1)[:B].reshape(B, 1)


def init_params(key, input_size, hidden_size=128):
    """PyTorch nn.Linear default init, torch weight layout (out_features, in_features)."""
    k1, k2, k3, k4 = jax.random.split(key, 4)
    lim1 = 1.0 / jnp.sqrt(input_size)
    lim2 = 1.0 / jnp.sqrt(hidden_size)
    w1 = jax.random.uniform(k1, (hidden_size, input_size), jnp.float32, -lim1, lim1)
    b1 = jax.random.uniform(k2, (hidden_size,), jnp.float32, -lim1, lim1)
    w2 = jax.random.uniform(k3, (1, hidden_size), jnp.float32, -lim2, lim2)
    b2 = jax.random.uniform(k4, (1,), jnp.float32, -lim2, lim2)
    return w1, b1, w2, b2


def _reference(x, w1, b1, w2, b2):
    h = jnp.maximum(x @ w1.T + b1, 0.0)
    return jax.nn.sigmoid(h @ w2.T + b2)


if __name__ == "__main__":
    INPUT_SIZE = 32
    HIDDEN = 128

    key = jax.random.PRNGKey(0)
    kx1, kx2, kp = jax.random.split(key, 3)
    w1, b1, w2, b2 = init_params(kp, INPUT_SIZE, HIDDEN)

    # One-time parameter prep (hoisted out of the forward wrapper).
    params_bf16 = prepare_params(w1, b1, w2, b2)                       # bf16 default
    params_f32 = prepare_params(w1, b1, w2, b2, mxu_dtype=jnp.float32)  # exact path

    # Two cases: tiny batch (single padded tile) and a ragged batch (300 -> 384)
    # that exercises the 128-multiple padding and tile selection.
    for batch, kk in ((8, kx1), (300, kx2)):
        x = jax.random.normal(kk, (batch, INPUT_SIZE), jnp.float32)
        ref = _reference(x, w1, b1, w2, b2)

        # Default bf16 MXU path: f32 accumulation, relaxed tolerance for the
        # bf16 input/weight rounding.
        out_bf16 = jax.block_until_ready(discriminator_forward(x, params_bf16))
        assert out_bf16.shape == (batch, 1), out_bf16.shape
        assert jnp.allclose(out_bf16, ref, atol=2e-2, rtol=2e-2), \
            float(jnp.max(jnp.abs(out_bf16 - ref)))

        # Exact f32 path: tight tolerance (exact sigmoid, f32 matmul).
        out_f32 = jax.block_until_ready(discriminator_forward(x, params_f32))
        assert out_f32.shape == (batch, 1), out_f32.shape
        assert jnp.allclose(out_f32, ref, atol=1e-5, rtol=1e-5), \
            float(jnp.max(jnp.abs(out_f32 - ref)))

    print("KERNEL_OK")
</pallas_src>

<mosaic_0001>
module attributes {stable_mosaic.version = 11 : i64} {
  func.func @_disc_kernel(%arg0: i32, %arg1: memref<128x32xbf16, #tpu.memory_space<vmem>>, %arg2: memref<128x32xbf16, #tpu.memory_space<vmem>>, %arg3: memref<128x1xf32, #tpu.memory_space<vmem>>, %arg4: memref<128x1xf32, #tpu.memory_space<vmem>>, %arg5: memref<1x1xf32, #tpu.memory_space<smem>>, %arg6: memref<1x128xf32, #tpu.memory_space<vmem>>) attributes {dimension_semantics = [#tpu.dimension_semantics<parallel>], iteration_bounds = array<i64: 1>, scalar_prefetch = 0 : i64, scratch_operands = 0 : i64, tpu.core_type = #tpu.core_type<tc>, window_params = [{transform_indices = @transform_0, window_bounds = array<i64: 128, 32>}, {pipeline_mode = #tpu.pipeline_mode<synchronous>, transform_indices = @transform_1, window_bounds = array<i64: 128, 32>}, {pipeline_mode = #tpu.pipeline_mode<synchronous>, transform_indices = @transform_2, window_bounds = array<i64: 128, 1>}, {pipeline_mode = #tpu.pipeline_mode<synchronous>, transform_indices = @transform_3, window_bounds = array<i64: 128, 1>}, {transform_indices = @transform_4, window_bounds = array<i64: 1, 1>}, {transform_indices = @transform_5, window_bounds = array<i64: 1, 128>}]} {
    %c0 = arith.constant 0 : index
    %c0_0 = arith.constant 0 : index
    %0 = vector.load %arg2[%c0, %c0_0] : memref<128x32xbf16, #tpu.memory_space<vmem>>, vector<128x32xbf16>
    %c0_1 = arith.constant 0 : index
    %c0_2 = arith.constant 0 : index
    %1 = vector.load %arg1[%c0_1, %c0_2] : memref<128x32xbf16, #tpu.memory_space<vmem>>, vector<128x32xbf16>
    %cst = arith.constant dense<0.000000e+00> : vector<128x128xf32>
    %2 = tpu.matmul %0, %1, %cst {dimension_numbers = #tpu.dot_dimension_numbers<[1], [1], [0], [0], [0, 0, 1, 0], [], []>} : vector<128x32xbf16>, vector<128x32xbf16>, vector<128x128xf32> -> vector<128x128xf32>
    %c0_3 = arith.constant 0 : index
    %c0_4 = arith.constant 0 : index
    %3 = vector.load %arg3[%c0_3, %c0_4] : memref<128x1xf32, #tpu.memory_space<vmem>>, vector<128x1xf32>
    %4 = vector.broadcast %3 : vector<128x1xf32> to vector<128x128xf32>
    %5 = arith.addf %2, %4 : vector<128x128xf32>
    %cst_5 = arith.constant 0.000000e+00 : f32
    %6 = vector.broadcast %cst_5 : f32 to vector<128x128xf32>
    %7 = arith.maximumf %5, %6 : vector<128x128xf32>
    %c0_6 = arith.constant 0 : index
    %c0_7 = arith.constant 0 : index
    %8 = vector.load %arg4[%c0_6, %c0_7] : memref<128x1xf32, #tpu.memory_space<vmem>>, vector<128x1xf32>
    %9 = vector.broadcast %8 : vector<128x1xf32> to vector<128x128xf32>
    %10 = arith.mulf %7, %9 : vector<128x128xf32>
    %cst_8 = arith.constant dense<0.000000e+00> : vector<128xf32>
    %11 = vector.multi_reduction <add>, %10, %cst_8 [0] : vector<128x128xf32> to vector<128xf32>
    %12 = vector.shape_cast %11 : vector<128xf32> to vector<1x128xf32>
    %c0_9 = arith.constant 0 : index
    %c0_10 = arith.constant 0 : index
    %13 = memref.load %arg5[%c0_9, %c0_10] : memref<1x1xf32, #tpu.memory_space<smem>>
    %14 = vector.broadcast %13 : f32 to vector<1x128xf32>
    %15 = arith.addf %12, %14 : vector<1x128xf32>
    %16 = arith.negf %15 : vector<1x128xf32>
    %17 = math.exp %16 : vector<1x128xf32>
    %cst_11 = arith.constant 1.000000e+00 : f32
    %18 = vector.broadcast %cst_11 : f32 to vector<1x128xf32>
    %19 = arith.addf %18, %17 : vector<1x128xf32>
    %20 = arith.divf %18, %19 : vector<1x128xf32>
    %c0_12 = arith.constant 0 : index
    %c0_13 = arith.constant 0 : index
    %21 = vector.load %arg6[%c0_12, %c0_13] : memref<1x128xf32, #tpu.memory_space<vmem>>, vector<1x128xf32>
    tpu.vector_store %arg6[%c0_12, %c0_13], %20 {strides = array<i32>} : memref<1x128xf32, #tpu.memory_space<vmem>>, vector<1x128xf32>,
    return
  }
  func.func @transform_0(%arg0: i32) -> (i32, i32) {
    %c0_i32 = arith.constant 0 : i32
    %c0_i32_0 = arith.constant 0 : i32
    return %arg0, %c0_i32 : i32, i32
  }
  func.func @transform_1(%arg0: i32) -> (i32, i32) {
    %c0_i32 = arith.constant 0 : i32
    %c0_i32_0 = arith.constant 0 : i32
    %c0_i32_1 = arith.constant 0 : i32
    return %c0_i32, %c0_i32_0 : i32, i32
  }
  func.func @transform_2(%arg0: i32) -> (i32, i32) {
    %c0_i32 = arith.constant 0 : i32
    %c0_i32_0 = arith.constant 0 : i32
    %c0_i32_1 = arith.constant 0 : i32
    return %c0_i32, %c0_i32_0 : i32, i32
  }
  func.func @transform_3(%arg0: i32) -> (i32, i32) {
    %c0_i32 = arith.constant 0 : i32
    %c0_i32_0 = arith.constant 0 : i32
    %c0_i32_1 = arith.constant 0 : i32
    return %c0_i32, %c0_i32_0 : i32, i32
  }
  func.func @transform_4(%arg0: i32) -> (i32, i32) {
    %c0_i32 = arith.constant 0 : i32
    %c0_i32_0 = arith.constant 0 : i32
    %c0_i32_1 = arith.constant 0 : i32
    return %c0_i32, %c0_i32_0 : i32, i32
  }
  func.func @transform_5(%arg0: i32) -> (i32, i32) {
    %c0_i32 = arith.constant 0 : i32
    %c0_i32_0 = arith.constant 0 : i32
    return %c0_i32, %arg0 : i32, i32
  }
}

</mosaic_0001>

<bundles_post_ra>
// kernel: tpu_custom_call.1
= control target key start
LH: loop header
LB: loop body
LE: loop exit
PB: predicated region body
PF: predicated region fallthrough
CT: control target
= control target key end

     0   :  { %vm230_vm0 = vcmask 261120   ;;  %v664_v3 = vmov 0   ;;  %s868_s0 = inlined_call_operand.vmem [shape: bf16[128,32], index: 0, kind: input, shape index: {}]   ;;  %s869_s1 = inlined_call_operand.vmem [shape: bf16[128,32], index: 1, kind: input, shape index: {}]   ;;  %s870_s2 = inlined_call_operand.vmem [shape: f32[128,1], index: 2, kind: input, shape index: {}]   ;;  %s871_s3 = inlined_call_operand.vmem [shape: f32[128,1], index: 3, kind: input, shape index: {}]   ;;  %s872_s4 = inlined_call_operand.<no memory space> [shape: f32[1,1], index: 4, kind: input, shape index: {}]   ;;  %s873_s5 = inlined_call_operand.hbm [shape: f32[1,128], index: 5, kind: output, shape index: {}]  }
   0x1   :  { %v56_v0 = vld [vmem:[%s870_s2 + $0x10] sm:$0xff]  ;;  %v54_v1 = vld [vmem:[%s870_s2] sm:$0xff]  ;;  %v604_v2 = vld [vmem:[%s868_s0 + $0x38] sm:$0xff]  ;;  %632 = vset.pattern.permute.xlu1 %v664_v3  ;;  %631 = vset.pattern.permute.xlu0 %v664_v3 }
   0x2   :  { %82 = vperm.xlu1 %632, %v56_v0   ;;  %72 = vperm.xlu0 %631, %v54_v1   ;;  %v277_v4 = vsel %vm230_vm0, %v604_v2, 0  ;;  %v58_v5 = vld [vmem:[%s870_s2 + $0x20] sm:$0xff]  ;;  %v603_v6 = vld [vmem:[%s868_s0 + $0x30] sm:$0xff]  ;;  %v57_v7 = vld [vmem:[%s870_s2 + $0x18] sm:$0xff] }
   0x3   :  { %279 = vmatpush.bf16.xpose.msra.mxu0 %v277_v4  ;;  %605 = vmatpush.bf16.xpose.msra.mxu1 %v277_v4  ;;  %v55_v8 = vld [vmem:[%s870_s2 + $0x8] sm:$0xff] }
   0x4   :  { %606 = vmatpush.bf16.xpose.msra.mxu2 %v277_v4  ;;  %607 = vmatpush.bf16.xpose.msra.mxu3 %v277_v4 }
   0x5   :  { %633 = vset.pattern.permute.xlu2 %v664_v3 }
   0x6   :  { %92 = vperm.xlu2 %633, %v58_v5  }
   0x7   :  { %11 = vsyncpa [#allocation4], 0  ;;  %v274_v9 = vsel %vm230_vm0, %v603_v6, 0  ;;  %v59_v10 = vld [vmem:[%s870_s2 + $0x28] sm:$0xff]  ;;  %v61_v12 = vld [vmem:[%s870_s2 + $0x38] sm:$0xff]  ;;  %s665_s11 = smov [#allocation3]  }
   0x8   :  { %v602_v11 = vld [vmem:[%s868_s0 + $0x28] sm:$0xff]  ;;  %v60_v13 = vld [vmem:[%s870_s2 + $0x30] sm:$0xff]  ;;  %v62_v15 = vld [vmem:[%s870_s2 + $0x40] sm:$0xff]  ;;  %s505_s12 = sshll.u32 %s665_s11, 4  ;;  %s506_s12 = int_to_ptr.vmem [resolvable:$true] %s505_s12 }
   0x9   :  { %v271_v14 = vsel %vm230_vm0, %v602_v11, 0  ;;  %v601_v16 = vld [vmem:[%s868_s0 + $0x20] sm:$0xff]  ;;  %v64_v17 = vld [vmem:[%s870_s2 + $0x50] sm:$0xff]  ;;  %v63_v18 = vld [vmem:[%s870_s2 + $0x48] sm:$0xff] }
   0xa   :  { %87 = vperm.xlu1 %632, %v57_v7   ;;  %77 = vperm.xlu0 %631, %v55_v8   ;;  %v268_v19 = vsel %vm230_vm0, %v601_v16, 0  ;;  %v65_v20 = vld [vmem:[%s870_s2 + $0x58] sm:$0xff]  ;;  %v344_v22 = vld [vmem:[%s871_s3] sm:$0xff]  ;;  %v345_v25 = vld [vmem:[%s871_s3 + $0x8] sm:$0xff] }
   0xb   :  { %280 = vmatpush.bf16.xpose.msra.mxu0 %v274_v9  ;;  %608 = vmatpush.bf16.xpose.msra.mxu1 %v274_v9  ;;  %v600_v21 = vld [vmem:[%s868_s0 + $0x18] sm:$0xff]  ;;  %v66_v23 = vld [vmem:[%s870_s2 + $0x60] sm:$0xff]  ;;  %v599_v26 = vld [vmem:[%s868_s0 + $0x10] sm:$0xff] }
   0xc   :  { %609 = vmatpush.bf16.xpose.msra.mxu2 %v274_v9  ;;  %610 = vmatpush.bf16.xpose.msra.mxu3 %v274_v9  ;;  %v265_v24 = vsel %vm230_vm0, %v600_v21, 0  ;;  %v347_v27 = vld [vmem:[%s871_s3 + $0x18] sm:$0xff]  ;;  %v346_v28 = vld [vmem:[%s871_s3 + $0x10] sm:$0xff]  ;;  %v262_v29 = vsel %vm230_vm0, %v599_v26, 0  ;;  %v348_v30 = vld [vmem:[%s871_s3 + $0x20] sm:$0xff] }
   0xd   :  { %v598_v31 = vld [vmem:[%s868_s0 + $0x8] sm:$0xff]  ;;  %v350_v32 = vld [vmem:[%s871_s3 + $0x30] sm:$0xff]  ;;  %v351_v35 = vld [vmem:[%s871_s3 + $0x38] sm:$0xff] }
   0xe   :  { %97 = vperm.xlu2 %633, %v59_v10   ;;  %v349_v33 = vld [vmem:[%s871_s3 + $0x28] sm:$0xff]  ;;  %v259_v34 = vsel %vm230_vm0, %v598_v31, 0  ;;  %v597_v36 = vld [vmem:[%s868_s0] sm:$0xff]  ;;  %v354_v40 = vld [vmem:[%s871_s3 + $0x50] sm:$0xff] }
   0xf   :  { %v353_v37 = vld [vmem:[%s871_s3 + $0x48] sm:$0xff]  ;;  %v352_v38 = vld [vmem:[%s871_s3 + $0x40] sm:$0xff]  ;;  %v256_v39 = vsel %vm230_vm0, %v597_v36, 0  ;;  %v355_v41 = vld [vmem:[%s871_s3 + $0x58] sm:$0xff] }
  0x10   :  { %v67_v42 = vld [vmem:[%s870_s2 + $0x68] sm:$0xff]  ;;  %v589_v43 = vld [vmem:[%s869_s1] sm:$0xff]  ;;  %v591_v44 = vld [vmem:[%s869_s1 + $0x10] sm:$0xff] }
  0x11   :  { %v593_v45 = vld [vmem:[%s869_s1 + $0x20] sm:$0xff]  ;;  %v595_v46 = vld [vmem:[%s869_s1 + $0x30] sm:$0xff]  ;;  %v69_v48 = vld [vmem:[%s870_s2 + $0x78] sm:$0xff] }
  0x12   :  { %107 = vperm.xlu1 %632, %v61_v12   ;;  %102 = vperm.xlu0 %631, %v60_v13   ;;  %v68_v47 = vld [vmem:[%s870_s2 + $0x70] sm:$0xff]  ;;  %v356_v49 = vld [vmem:[%s871_s3 + $0x60] sm:$0xff]  ;;  %v357_v50 = vld [vmem:[%s871_s3 + $0x68] sm:$0xff] }
  0x13   :  { %281 = vmatpush.bf16.xpose.msra.mxu0 %v271_v14  ;;  %611 = vmatpush.bf16.xpose.msra.mxu1 %v271_v14  ;;  %v359_v51 = vld [vmem:[%s871_s3 + $0x78] sm:$0xff]  ;;  %v358_v52 = vld [vmem:[%s871_s3 + $0x70] sm:$0xff]  ;;  %v590_v53 = vld [vmem:[%s869_s1 + $0x8] sm:$0xff] }
  0x14   :  { %612 = vmatpush.bf16.xpose.msra.mxu2 %v271_v14  ;;  %613 = vmatpush.bf16.xpose.msra.mxu3 %v271_v14  ;;  %v592_v54 = vld [vmem:[%s869_s1 + $0x18] sm:$0xff]  ;;  %v594_v55 = vld [vmem:[%s869_s1 + $0x28] sm:$0xff] }
  0x15   :  { %v596_v56 = vld [vmem:[%s869_s1 + $0x38] sm:$0xff] }
  0x16   :  { %112 = vperm.xlu2 %633, %v62_v15  }
  0x1a   :  { %122 = vperm.xlu1 %632, %v64_v17   ;;  %117 = vperm.xlu0 %631, %v63_v18  }
  0x1b   :  { %282 = vmatpush.bf16.xpose.msra.mxu0 %v268_v19  ;;  %614 = vmatpush.bf16.xpose.msra.mxu1 %v268_v19 }
  0x1c   :  { %615 = vmatpush.bf16.xpose.msra.mxu2 %v268_v19  ;;  %616 = vmatpush.bf16.xpose.msra.mxu3 %v268_v19 }
  0x1e   :  { %127 = vperm.xlu2 %633, %v65_v20  }
  0x22   :  { %362 = vperm.xlu1 %632, %v344_v22   ;;  %132 = vperm.xlu0 %631, %v66_v23  }
  0x23   :  { %283 = vmatpush.bf16.xpose.msra.mxu0 %v265_v24  ;;  %617 = vmatpush.bf16.xpose.msra.mxu1 %v265_v24 }
  0x24   :  { %618 = vmatpush.bf16.xpose.msra.mxu2 %v265_v24  ;;  %619 = vmatpush.bf16.xpose.msra.mxu3 %v265_v24 }
  0x26   :  { %367 = vperm.xlu2 %633, %v345_v25  }
  0x2a   :  { %377 = vperm.xlu1 %632, %v347_v27   ;;  %372 = vperm.xlu0 %631, %v346_v28  }
  0x2b   :  { %284 = vmatpush.bf16.xpose.msra.mxu0 %v262_v29  ;;  %620 = vmatpush.bf16.xpose.msra.mxu1 %v262_v29 }
  0x2c   :  { %621 = vmatpush.bf16.xpose.msra.mxu2 %v262_v29  ;;  %622 = vmatpush.bf16.xpose.msra.mxu3 %v262_v29 }
  0x2e   :  { %382 = vperm.xlu2 %633, %v348_v30  }
  0x32   :  { %392 = vperm.xlu1 %632, %v350_v32   ;;  %387 = vperm.xlu0 %631, %v349_v33  }
  0x33   :  { %285 = vmatpush.bf16.xpose.msra.mxu0 %v259_v34  ;;  %623 = vmatpush.bf16.xpose.msra.mxu1 %v259_v34 }
  0x34   :  { %624 = vmatpush.bf16.xpose.msra.mxu2 %v259_v34  ;;  %625 = vmatpush.bf16.xpose.msra.mxu3 %v259_v34 }
  0x36   :  { %397 = vperm.xlu2 %633, %v351_v35  }
  0x3a   :  { %407 = vperm.xlu1 %632, %v353_v37   ;;  %402 = vperm.xlu0 %631, %v352_v38  }
  0x3b   :  { %286 = vmatpush.bf16.xpose.msra.mxu0 %v256_v39  ;;  %626 = vmatpush.bf16.xpose.msra.mxu1 %v256_v39 }
  0x3c   :  { %627 = vmatpush.bf16.xpose.msra.mxu2 %v256_v39  ;;  %628 = vmatpush.bf16.xpose.msra.mxu3 %v256_v39 }
  0x3e   :  { %412 = vperm.xlu2 %633, %v354_v40  }
  0x42   :  { %417 = vperm.xlu1 %632, %v355_v41   ;;  %137 = vperm.xlu0 %631, %v67_v42  }
  0x43   :  { %580 = vmatmul.msk.bf16.vlgmr.msra.gmra.mxu0 %vm230_vm0, %v589_v43  ;;  %582 = vmatmul.msk.bf16.vlgmr.msra.gmra.mxu1 %vm230_vm0, %v591_v44 }
  0x44   :  { %584 = vmatmul.msk.bf16.vlgmr.msra.gmra.mxu2 %vm230_vm0, %v593_v45  ;;  %586 = vmatmul.msk.bf16.vlgmr.msra.gmra.mxu3 %vm230_vm0, %v595_v46 }
  0x46   :  { %142 = vperm.xlu2 %633, %v68_v47  }
  0x4a   :  { %147 = vperm.xlu1 %632, %v69_v48   ;;  %422 = vperm.xlu0 %631, %v356_v49  }
  0x4e   :  { %427 = vperm.xlu2 %633, %v357_v50  }
  0x52   :  { %437 = vperm.xlu1 %632, %v359_v51   ;;  %432 = vperm.xlu0 %631, %v358_v52  }
  0x53   :  { %581 = vmatmul.msk.bf16.gmra.mxu0 %vm230_vm0, %v590_v53  ;;  %583 = vmatmul.msk.bf16.gmra.mxu1 %vm230_vm0, %v592_v54 }
  0x54   :  { %585 = vmatmul.msk.bf16.gmra.mxu2 %vm230_vm0, %v594_v55  ;;  %587 = vmatmul.msk.bf16.gmra.mxu3 %vm230_vm0, %v596_v56 }
  0x60   :  { %v93_v59 = vpop.permute.xlu2 %92 }
  0x68   :  { %v98_v62 = vpop.permute.xlu2 %97 }
  0x70   :  { %v113_v1 = vpop.permute.xlu2 %112 }
  0x74   :  { %v73_v57 = vpop.permute.xlu0 %72  ;;  %v83_v58 = vpop.permute.xlu1 %82 }
  0x78   :  { %v856_v4 = vpop.permute.xlu2 %127 }
  0x7c   :  { %v78_v60 = vpop.permute.xlu0 %77  ;;  %v88_v61 = vpop.permute.xlu1 %87 }
  0x80   :  { %v368_v7 = vpop.permute.xlu2 %367 }
  0x84   :  { %v103_v63 = vpop.permute.xlu0 %102  ;;  %v108_v0 = vpop.permute.xlu1 %107 }
  0x88   :  { %v383_v12 = vpop.permute.xlu2 %382 }
  0x8c   :  { %v118_v2 = vpop.permute.xlu0 %117  ;;  %v123_v3 = vpop.permute.xlu1 %122 }
  0x90   :  { %v398_v25 = vpop.permute.xlu2 %397 }
  0x94   :  { %v858_v5 = vpop.permute.xlu0 %132  ;;  %v363_v6 = vpop.permute.xlu1 %362 }
  0x98   :  { %v413_v45 = vpop.permute.xlu2 %412 }
  0x9c   :  { %v373_v8 = vpop.permute.xlu0 %372  ;;  %v378_v11 = vpop.permute.xlu1 %377 }
  0xa4   :  { %v388_v16 = vpop.permute.xlu0 %387  ;;  %v393_v17 = vpop.permute.xlu1 %392 }
  0xac   :  { %v403_v27 = vpop.permute.xlu0 %402  ;;  %v408_v30 = vpop.permute.xlu1 %407 }
  0xb4   :  { %v138_v50 = vpop.permute.xlu0 %137  ;;  %v418_v55 = vpop.permute.xlu1 %417 }
  0xc0   :  { %v288_v9 = vpop.f32.mrf.mxu0  ;;  %v298_v10 = vpop.f32.mrf.mxu1 }
  0xc1   :  { %v289_v23 = vadd.f32 %v288_v9, %v73_v57  ;;  %v299_v32 = vadd.f32 %v298_v10, %v93_v59 }
  0xc3   :  { %v328_v28 = vmax.f32 %v289_v23, 0.0  ;;  %v332_v41 = vmax.f32 %v299_v32, 0.0 }
  0xc5   :  { %v440_v36 = vmul.f32 %v363_v6, %v328_v28  ;;  %v444_v51 = vmul.f32 %v383_v12, %v332_v41 }
  0xc7   :  { %v308_v13 = vpop.f32.mrf.mxu2  ;;  %v318_v18 = vpop.f32.mrf.mxu3 }
  0xc8   :  { %v290_v14 = vpop.f32.mrf.mxu0  ;;  %v300_v15 = vpop.f32.mrf.mxu1  ;;  %v309_v52 = vadd.f32 %v308_v13, %v113_v1  ;;  %v319_v12 = vadd.f32 %v318_v18, %v858_v5 }
  0xc9   :  { %v291_v19 = vadd.f32 %v290_v14, %v78_v60  ;;  %v301_v37 = vadd.f32 %v300_v15, %v98_v62  ;;  %v423_v15 = vpop.permute.xlu0 %422 }
  0xca   :  { %v336_v62 = vmax.f32 %v309_v52, 0.0 }
  0xcb   :  { %v329_v26 = vmax.f32 %v291_v19, 0.0  ;;  %v333_v46 = vmax.f32 %v301_v37, 0.0 }
  0xcc   :  { %v448_v1 = vmul.f32 %v403_v27, %v336_v62 }
  0xcd   :  { %v441_v33 = vmul.f32 %v368_v7, %v329_v26  ;;  %v445_v57 = vmul.f32 %v388_v16, %v333_v46 }
  0xcf   :  { %v310_v20 = vpop.f32.mrf.mxu2  ;;  %v320_v31 = vpop.f32.mrf.mxu3  ;;  %v456_v42 = vadd.f32 %v441_v33, %v440_v36 }
  0xd0   :  { %v293_v21 = vpop.f32.mrf.mxu0  ;;  %v303_v22 = vpop.f32.mrf.mxu1  ;;  %v321_v16 = vadd.f32 %v320_v31, %v138_v50 }
  0xd1   :  { %v294_v24 = vadd.f32 %v293_v21, %v83_v58  ;;  %v304_v43 = vadd.f32 %v303_v22, %v103_v63  ;;  %v311_v58 = vadd.f32 %v310_v20, %v118_v2  ;;  %v148_v21 = vpop.permute.xlu1 %147  ;;  %v433_v31 = vpop.permute.xlu0 %432 }
  0xd3   :  { %v330_v29 = vmax.f32 %v294_v24, 0.0  ;;  %v334_v53 = vmax.f32 %v304_v43, 0.0 }
  0xd5   :  { %v442_v38 = vmul.f32 %v373_v8, %v330_v29  ;;  %v446_v63 = vmul.f32 %v393_v17, %v334_v53  ;;  %v337_v8 = vmax.f32 %v311_v58, 0.0 }
  0xd7   :  { %v313_v34 = vpop.f32.mrf.mxu2  ;;  %v457_v47 = vadd.f32 %v456_v42, %v442_v38  ;;  %v323_v56 = vpop.f32.mrf.mxu3  ;;  %v449_v2 = vmul.f32 %v408_v30, %v337_v8 }
  0xd8   :  { %v295_v35 = vpop.f32.mrf.mxu0  ;;  %v305_v40 = vpop.f32.mrf.mxu1  ;;  %v314_v6 = vadd.f32 %v313_v34, %v123_v3  ;;  %v340_v3 = vmax.f32 %v319_v12, 0.0 }
  0xd9   :  { %v296_v39 = vadd.f32 %v295_v35, %v88_v61  ;;  %v306_v49 = vadd.f32 %v305_v40, %v108_v0  ;;  %v438_v36 = vpop.permute.xlu1 %437 }
  0xda   :  { %v338_v13 = vmax.f32 %v314_v6, 0.0  ;;  %v452_v27 = vmul.f32 %v423_v15, %v340_v3 }
  0xdb   :  { %v331_v44 = vmax.f32 %v296_v39, 0.0  ;;  %v335_v60 = vmax.f32 %v306_v49, 0.0 }
  0xdc   :  { %v450_v22 = vmul.f32 %v413_v45, %v338_v13  ;;  %v478_v45 = vstv %s872_s4  ;;  %s507_s4 = sshll.u32 %s873_s5, 4  ;;  %s508_s4 = int_to_ptr.hbm [resolvable:$true] %s507_s4 }
  0xdd   :  { %v443_v48 = vmul.f32 %v378_v11, %v331_v44  ;;  %v447_v9 = vmul.f32 %v398_v25, %v335_v60  ;;  %v143_v11 = vpop.permute.xlu2 %142  ;;  %v341_v25 = vmax.f32 %v321_v16, 0.0 }
  0xde   :  { %v324_v23 = vadd.f32 %v323_v56, %v143_v11 }
  0xdf   :  { %v458_v54 = vadd.f32 %v457_v47, %v443_v48  ;;  %v315_v61 = vpop.f32.mrf.mxu2  ;;  %v325_v17 = vpop.f32.mrf.mxu3 }
  0xe0   :  { %v316_v0 = vadd.f32 %v315_v61, %v856_v4  ;;  %v326_v28 = vadd.f32 %v325_v17, %v148_v21  ;;  %v342_v29 = vmax.f32 %v324_v23, 0.0 }
  0xe1   :  { %v459_v59 = vadd.f32 %v458_v54, %v444_v51 }
  0xe2   :  { %v339_v20 = vmax.f32 %v316_v0, 0.0  ;;  %v343_v30 = vmax.f32 %v326_v28, 0.0  ;;  %v454_v34 = vmul.f32 %v433_v31, %v342_v29 }
  0xe3   :  { %v460_v7 = vadd.f32 %v459_v59, %v445_v57 }
  0xe4   :  { %v451_v26 = vmul.f32 %v418_v55, %v339_v20  ;;  %v455_v37 = vmul.f32 %v438_v36, %v343_v30 }
  0xe5   :  { %v461_v10 = vadd.f32 %v460_v7, %v446_v63  ;;  %v428_v18 = vpop.permute.xlu2 %427 }
  0xe6   :  { %v453_v32 = vmul.f32 %v428_v18, %v341_v25 }
  0xe7   :  { %v462_v14 = vadd.f32 %v461_v10, %v447_v9 }
  0xe9   :  { %v463_v19 = vadd.f32 %v462_v14, %v448_v1 }
  0xeb   :  { %v464_v24 = vadd.f32 %v463_v19, %v449_v2 }
  0xed   :  { %v465_v4 = vadd.f32 %v464_v24, %v450_v22 }
  0xef   :  { %v466_v5 = vadd.f32 %v465_v4, %v451_v26 }
  0xf1   :  { %v467_v33 = vadd.f32 %v466_v5, %v452_v27 }
  0xf3   :  { %v468_v35 = vadd.f32 %v467_v33, %v453_v32 }
  0xf5   :  { %v469_v38 = vadd.f32 %v468_v35, %v454_v34 }
  0xf7   :  { %v470_v39 = vadd.f32 %v469_v38, %v455_v37 }
  0xf9   :  { %v471_v40 = vrot.slane %v470_v39, 4 }
  0xfb   :  { %v472_v41 = vadd.f32 %v471_v40, %v470_v39 }
  0xfd   :  { %v473_v42 = vrot.slane %v472_v41, 2 }
  0xff   :  { %v474_v43 = vadd.f32 %v473_v42, %v472_v41 }
 0x101   :  { %v475_v44 = vrot.slane %v474_v43, 1 }
 0x103   :  { %v476_v46 = vadd.f32 %v475_v44, %v474_v43 }
 0x105   :  { %v479_v47 = vadd.f32 %v478_v45, %v476_v46 }
 0x107   :  { %v588_v48 = vmul.f32 -1.442695, %v479_v47 }
 0x109   :  { %634 = vpow2.f32 %v588_v48 }
 0x10f   :  { %v635_v49 = vpop.eup %634 }
 0x110   :  { %v483_v50 = vadd.f32 1.0, %v635_v49 }
 0x112   :  { %636 = vrcp.f32 %v483_v50  ;;  %v495_v54 = vand.u32 2147483648, %v483_v50  ;;  %v493_v56 = vand.u32 2147483647, %v483_v50  ;;  %vm489_vm2 = vweird.f32 %v483_v50 }
 0x114   :  { %v496_v58 = vor.u32 1.1754944e-38, %v495_v54  ;;  %vm494_vm4 = vcmp.eq.f32.partialorder %v493_v56, 8.507059e+37 }
 0x118   :  { %v637_v51 = vpop.eup %636 }
 0x119   :  { %v485_v52 = vmul.f32 %v637_v51, %v483_v50  ;;  %vm490_vm1 = vweird.f32 %v637_v51 }
 0x11a   :  { %vm491_vm3 = vmor %vm489_vm2, %vm490_vm1 }
 0x11b   :  { %v486_v53 = vsub.f32 1.0, %v485_v52 }
 0x11d   :  { %v487_v55 = vmul.f32 %v637_v51, %v486_v53 }
 0x11f   :  { %v488_v57 = vadd.f32 %v637_v51, %v487_v55 }
 0x121   :  { %v492_v59 = vsel %vm491_vm3, %v637_v51, %v488_v57 }
 0x122   :  { %v497_v60 = vsel %vm494_vm4, %v496_v58, %v492_v59 }
 0x123   :  { %499 = vst [vmem:[#allocation3] sm:$0x1] %v497_v60 }
 0x124   :  { %510 = dma.vmem_to_hbm [thread:$0]  %s506_s12, 16, %s508_s4, [#allocation4]  }
 0x125   :  { %662 = dma.done.wait [#allocation4], 16  }
 0x126   :  { %663 = vsyncadd [#allocation4], 4294967280 }
 0x127   :  { %515 = vsyncpa [#allocation4], 1 }

</bundles_post_ra>
